<compile_context>
chip_gen: v6e
topology: v6e:2x2x1
jax: 0.10.0
libtpu: 0.0.40
codegen_flags: <defaults>
</compile_context>

<pallas_src>
import jax
import jax.numpy as jnp
from jax.experimental import pallas as pl
from jax.experimental.pallas import tpu as pltpu

_LANE = 384  # lcm(3, 128): lane-dense, and G3 triples never straddle a row.
assert _LANE % 3 == 0 and _LANE % 128 == 0


def _round_up(a, b):
    return ((a + b - 1) // b) * b


def _reference(x):
    """Pure-JAX reference of CliffordG3SumVSiLU.forward."""
    return jax.nn.sigmoid(x.sum(-1, keepdims=True)) * x


def _sum_vsilu_kernel(x_ref, o_ref):
    x = x_ref[...]                                  # (tm, L), input dtype
    L = x.shape[-1]
    # Correctness of the roll/mask trick requires the lane block to be a
    # multiple of both 3 (group alignment) and 128 (lane density).
    assert L % 3 == 0 and L % 128 == 0
    # Group-of-3 sums anchored at lanes i % 3 == 0:
    #   s[i] = x[i] + x[i+1] + x[i+2]
    # (roll by L-1 / L-2 == shift by -1 / -2; wrap-around only lands on
    #  non-anchor lanes that the mask below zeroes out, since L % 3 == 0).
    s = x + pltpu.roll(x, L - 1, axis=1) + pltpu.roll(x, L - 2, axis=1)
    lane = jax.lax.broadcasted_iota(jnp.int32, (1, L), 1)   # (1, L): hoisted, cheap
    t = jnp.where(lane % 3 == 0, s, 0.0)
    # Broadcast each anchor's group sum to the other two lanes of its group.
    u = t + pltpu.roll(t, 1, axis=1) + pltpu.roll(t, 2, axis=1)
    gate = jax.nn.sigmoid(u.astype(jnp.float32)).astype(x.dtype)
    o_ref[...] = (gate * x).astype(o_ref.dtype)


def clifford_g3_sum_vsilu(x, *, block_rows=2048):
    """sigmoid(x.sum(-1, keepdims=True)) * x for x of shape (..., 3)."""
    assert x.shape[-1] == 3, "trailing axis must hold the 3 G3 vector components"
    orig_shape = x.shape
    total = x.size                          # multiple of 3
    flat = x.reshape(-1)                    # contiguous view, free

    rows = total // _LANE                   # full 384-lane rows
    tail = total - rows * _LANE             # leftover elements (< 384, multiple of 3)

    # Tiny inputs: not worth a kernel launch.
    if rows < 8:
        return _reference(x)

    # TODO(synk): when tail > 0 the prefix slice costs one extra copy of the
    # main body; a fused masked-final-row kernel would avoid it.
    main = flat[: rows * _LANE] if tail else flat
    x2 = main.reshape(rows, _LANE)

    # Block sizing: >= 2 grid steps whenever possible (megacore on v7x + DMA /
    # compute pipelining on all generations), capped so 2 arrays x 2 pipeline
    # buffers stay well under VMEM on v5e / v6e / v7x.
    tm = max(8, min(block_rows, _round_up(pl.cdiv(rows, 4), 8)))
    grid = pl.cdiv(rows, tm)    # last block may be ragged; Pallas masks OOB rows

    out2 = pl.pallas_call(
        _sum_vsilu_kernel,
        out_shape=jax.ShapeDtypeStruct((rows, _LANE), x.dtype),
        grid_spec=pltpu.PrefetchScalarGridSpec(
            num_scalar_prefetch=0,
            grid=(grid,),
            in_specs=[pl.BlockSpec((tm, _LANE), lambda i: (i, 0))],
            out_specs=pl.BlockSpec((tm, _LANE), lambda i: (i, 0)),
        ),
        compiler_params=pltpu.CompilerParams(
            dimension_semantics=("parallel",),
            vmem_limit_bytes=48 << 20,
        ),
    )(x2)

    out_flat = out2.reshape(-1)
    if tail:
        tail_out = _reference(flat[rows * _LANE:].reshape(-1, 3)).reshape(-1)
        out_flat = jnp.concatenate([out_flat, tail_out])
    return out_flat.reshape(orig_shape)


if __name__ == "__main__":
    key = jax.random.PRNGKey(0)
    fn = jax.jit(clifford_g3_sum_vsilu)

    # Typical gcan.py usage: G3 vector feature maps (B, C, H, W, 3).
    B, C, H, W = 2, 4, 16, 16
    x = jax.random.normal(key, (B, C, H, W, 3), dtype=jnp.float32)
    out = jax.block_until_ready(fn(x))
    ref = _reference(x)
    assert out.shape == x.shape, out.shape
    assert jnp.allclose(out, ref, atol=1e-5, rtol=1e-5), float(jnp.max(jnp.abs(out - ref)))

    # Ragged shape: exercises the ragged final grid block and the <384-element
    # pure-JAX tail epilogue.
    x2 = jax.random.normal(jax.random.PRNGKey(1), (3, 5, 17, 19, 3), dtype=jnp.float32)
    out2 = jax.block_until_ready(fn(x2))
    ref2 = _reference(x2)
    assert out2.shape == x2.shape, out2.shape
    assert jnp.allclose(out2, ref2, atol=1e-5, rtol=1e-5), float(jnp.max(jnp.abs(out2 - ref2)))

    print("KERNEL_OK")
</pallas_src>

<mosaic_0001>
module attributes {stable_mosaic.version = 11 : i64} {
  func.func @_sum_vsilu_kernel(%arg0: i32, %arg1: memref<8x384xf32, #tpu.memory_space<vmem>>, %arg2: memref<8x384xf32, #tpu.memory_space<vmem>>) attributes {dimension_semantics = [#tpu.dimension_semantics<parallel>], iteration_bounds = array<i64: 2>, scalar_prefetch = 0 : i64, scratch_operands = 0 : i64, tpu.core_type = #tpu.core_type<tc>, window_params = [{transform_indices = @transform_0, window_bounds = array<i64: 8, 384>}, {transform_indices = @transform_1, window_bounds = array<i64: 8, 384>}]} {
    %c0 = arith.constant 0 : index
    %c0_0 = arith.constant 0 : index
    %0 = vector.load %arg1[%c0, %c0_0] : memref<8x384xf32, #tpu.memory_space<vmem>>, vector<8x384xf32>
    %c383_i32 = arith.constant 383 : i32
    %1 = tpu.dynamic_rotate %0 by %c383_i32 dim 1 : vector<8x384xf32>, i32 -> vector<8x384xf32>
    %2 = arith.addf %0, %1 : vector<8x384xf32>
    %c382_i32 = arith.constant 382 : i32
    %3 = tpu.dynamic_rotate %0 by %c382_i32 dim 1 : vector<8x384xf32>, i32 -> vector<8x384xf32>
    %4 = arith.addf %2, %3 : vector<8x384xf32>
    %5 = tpu.iota {dimensions = array<i32: 1>} : vector<1x384xi32>
    %c3_i32 = arith.constant 3 : i32
    %c0_i32 = arith.constant 0 : i32
    %6 = arith.cmpi eq, %c3_i32, %c0_i32 : i32
    %c1_i32 = arith.constant 1 : i32
    %7 = arith.select %6, %c1_i32, %c3_i32 : i32
    %8 = vector.broadcast %7 : i32 to vector<1x384xi32>
    %9 = arith.remsi %5, %8 : vector<1x384xi32>
    %c0_i32_1 = arith.constant 0 : i32
    %10 = vector.broadcast %c0_i32_1 : i32 to vector<1x384xi32>
    %11 = arith.cmpi ne, %9, %10 : vector<1x384xi32>
    %c0_i32_2 = arith.constant 0 : i32
    %12 = vector.broadcast %c0_i32_2 : i32 to vector<1x384xi32>
    %13 = arith.cmpi slt, %9, %12 : vector<1x384xi32>
    %c0_i32_3 = arith.constant 0 : i32
    %14 = arith.cmpi slt, %7, %c0_i32_3 : i32
    %15 = vector.broadcast %14 : i1 to vector<1x384xi1>
    %16 = vector.broadcast %15 : vector<1x384xi1> to vector<1x384xi1>
    %17 = arith.xori %13, %16 : vector<1x384xi1>
    %18 = arith.andi %17, %11 : vector<1x384xi1>
    %19 = vector.broadcast %7 : i32 to vector<1x384xi32>
    %20 = arith.addi %9, %19 : vector<1x384xi32>
    %21 = arith.select %18, %20, %9 : vector<1x384xi1>, vector<1x384xi32>
    %c0_i32_4 = arith.constant 0 : i32
    %22 = vector.broadcast %c0_i32_4 : i32 to vector<1x384xi32>
    %23 = arith.cmpi eq, %21, %22 : vector<1x384xi32>
    %cst = arith.constant 0.000000e+00 : f32
    %24 = vector.shape_cast %23 : vector<1x384xi1> to vector<1x384xi1>
    %25 = vector.broadcast %24 : vector<1x384xi1> to vector<8x384xi1>
    %26 = vector.broadcast %cst : f32 to vector<8x384xf32>
    %27 = arith.select %25, %4, %26 : vector<8x384xi1>, vector<8x384xf32>
    %c1_i32_5 = arith.constant 1 : i32
    %28 = tpu.dynamic_rotate %27 by %c1_i32_5 dim 1 : vector<8x384xf32>, i32 -> vector<8x384xf32>
    %29 = arith.addf %27, %28 : vector<8x384xf32>
    %c2_i32 = arith.constant 2 : i32
    %30 = tpu.dynamic_rotate %27 by %c2_i32 dim 1 : vector<8x384xf32>, i32 -> vector<8x384xf32>
    %31 = arith.addf %29, %30 : vector<8x384xf32>
    %32 = arith.negf %31 : vector<8x384xf32>
    %33 = math.exp %32 : vector<8x384xf32>
    %cst_6 = arith.constant 1.000000e+00 : f32
    %34 = vector.broadcast %cst_6 : f32 to vector<8x384xf32>
    %35 = arith.addf %34, %33 : vector<8x384xf32>
    %36 = arith.divf %34, %35 : vector<8x384xf32>
    %37 = arith.mulf %36, %0 : vector<8x384xf32>
    %c0_7 = arith.constant 0 : index
    %c0_8 = arith.constant 0 : index
    %38 = vector.load %arg2[%c0_7, %c0_8] : memref<8x384xf32, #tpu.memory_space<vmem>>, vector<8x384xf32>
    tpu.vector_store %arg2[%c0_7, %c0_8], %37 {strides = array<i32>} : memref<8x384xf32, #tpu.memory_space<vmem>>, vector<8x384xf32>,
    return
  }
  func.func @transform_0(%arg0: i32) -> (i32, i32) {
    %c0_i32 = arith.constant 0 : i32
    %c0_i32_0 = arith.constant 0 : i32
    return %arg0, %c0_i32 : i32, i32
  }
  func.func @transform_1(%arg0: i32) -> (i32, i32) {
    %c0_i32 = arith.constant 0 : i32
    %c0_i32_0 = arith.constant 0 : i32
    return %arg0, %c0_i32 : i32, i32
  }
}

</mosaic_0001>

<bundles_post_ra>
// kernel: clifford_g3_sum_vsilu.1
= control target key start
LH: loop header
LB: loop body
LE: loop exit
PB: predicated region body
PF: predicated region fallthrough
CT: control target
= control target key end

     0   :  { %s380_s6 = smov 0   ;;  %s462_s0 = inlined_call_operand.vmem [shape: f32[16,384], index: 0, kind: input, shape index: {}]   ;;  %s463_s1 = inlined_call_operand.vmem [shape: f32[16,384], index: 1, kind: output, shape index: {}]  }
   0x1 LB: > { %s315_s7 = sadd.s32 4294967295, %s364_s6   ;;  %p319_p0 = scmp.ge.s32.totalorder %s364_s6, 1  ;;  %s364_s6 = sphi %s380_s6, %s11_s6  }
   0x2   : > { %p87_p1 = scmp.lt.s32.totalorder %s364_s6, 3 }
   0x4   : > { %p88_p2 = pnand %p319_p0, %p87_p1 }
   0x5   : > { %p107_p3 = scmp.lt.s32.totalorder (!%p88_p2), %s315_s7, 1  ;;  %s366_s12 = smov (!%p88_p2), 127  }
   0x6   : > { %91 = sbr.rel (%p88_p2) target bundleno = 306 (0x132), region = 24  ;;  %s367_s13 = smov (!%p88_p2), 126  }
   0x7   : > { %s368_s14 = smov (!%p88_p2), 1   ;;  %s369_s15 = smov (!%p88_p2), 2  }
   0xb   : > { %s471_s7 = smov (!%p107_p3, %s315_s7), 1  ;;  %v126_v3 = vlaneseq }
   0xc   : > { %s327_s8 = smul.u32 24, %s471_s7 }
   0xd   : > { %v408_v4 = vand.u32 127, %v126_v3 }
   0xe   : > { %s111_s11 = scalar_lea.vmem %s462_s0, %s327_s8  ;;  %s116_s18 = scalar_lea.vmem %s463_s1, %s327_s8 }
   0xf   : > { %v396_v0 = vld [vmem:[%s111_s11 + $0x10] sm:$0xff]  ;;  %v398_v1 = vld [vmem:[%s111_s11] sm:$0xff]  ;;  %v402_v2 = vld [vmem:[%s111_s11 + $0x8] sm:$0xff]  ;;  %v148_v5 = vadd.s32 128, %v408_v4  ;;  %v412_v6 = vmul.u32.u64.low 2863311531, %v408_v4  ;;  %v413_v7 = vmul.u32.u64.high 2863311531, %v408_v4, %v412_v6 }
  0x10   : > { %124 = vrot.lane.b32.xlu1 %v396_v0, %s366_s12  ;;  %120 = vrot.lane.b32.xlu0 %v398_v1, %s366_s12  ;;  %v149_v10 = vadd.s32 256, %v408_v4  ;;  %vm128_vm6 = vcmp.lt.s32.totalorder %v408_v4, 127  ;;  %vm141_vm9 = vcmp.lt.s32.totalorder %v408_v4, 126  ;;  %vm216_vm14 = vcmp.lt.s32.totalorder %v408_v4, 1 }
  0x11   : > { %v415_v8 = vmul.u32.u64.low 2863311531, %v148_v5  ;;  %v416_v9 = vmul.u32.u64.high 2863311531, %v148_v5, %v415_v8  ;;  %v156_v13 = vshrl.u32 %v413_v7, 1  ;;  %vm229_vm15 = vcmp.lt.s32.totalorder %v408_v4, 2 }
  0x12   : > { %v419_v11 = vmul.u32.u64.low 2863311531, %v149_v10  ;;  %v420_v12 = vmul.u32.u64.high 2863311531, %v149_v10, %v419_v11 }
  0x13   : > { %v167_v14 = vshrl.u32 %v416_v9, 1  ;;  %v157_v15 = vmul.u32 3, %v156_v13 }
  0x14   : > { %135 = vrot.lane.b32.xlu1 %v398_v1, %s367_s13  ;;  %122 = vrot.lane.b32.xlu0 %v402_v2, %s366_s12  ;;  %v178_v17 = vshrl.u32 %v420_v12, 1 }
  0x15   : > { %v168_v16 = vmul.u32 3, %v167_v14  ;;  %v158_v18 = vsub.s32 %v408_v4, %v157_v15 }
  0x16   : > { %v179_v20 = vmul.u32 3, %v178_v17 }
  0x17   : > { %v169_v19 = vsub.s32 %v148_v5, %v168_v16  ;;  %vm183_vm0 = vcmp.ne.s32.totalorder %v158_v18, 0  ;;  %vm186_vm1 = vcmp.lt.s32.totalorder %v158_v18, 0  ;;  %v192_v24 = vadd.s32 3, %v158_v18 }
  0x18   : > { %139 = vrot.lane.b32.xlu1 %v396_v0, %s367_s13  ;;  %137 = vrot.lane.b32.xlu0 %v402_v2, %s367_s13  ;;  %v180_v23 = vsub.s32 %v149_v10, %v179_v20  ;;  %vm426_vm4 = vmand %vm186_vm1, %vm183_vm0 }
  0x19   : > { %vm184_vm2 = vcmp.ne.s32.totalorder %v169_v19, 0  ;;  %vm187_vm3 = vcmp.lt.s32.totalorder %v169_v19, 0  ;;  %v193_v26 = vadd.s32 3, %v169_v19  ;;  %v195_v32 = vsel %vm426_vm4, %v192_v24, %v158_v18 }
  0x1a   : > { %vm430_vm5 = vmand %vm187_vm3, %vm184_vm2  ;;  %vm185_vm7 = vcmp.ne.s32.totalorder %v180_v23, 0  ;;  %vm188_vm8 = vcmp.lt.s32.totalorder %v180_v23, 0  ;;  %v194_v34 = vadd.s32 3, %v180_v23  ;;  %vm198_vm11 = vcmp.eq.s32.totalorder %v195_v32, 0 }
  0x1b   : > { %v196_v33 = vsel %vm430_vm5, %v193_v26, %v169_v19  ;;  %vm440_vm10 = vmand %vm188_vm8, %vm185_vm7 }
  0x1c   : > { %vm199_vm12 = vcmp.eq.s32.totalorder %v196_v33, 0  ;;  %v197_v47 = vsel %vm440_vm10, %v194_v34, %v180_v23 }
  0x1d   : > { %vm200_vm13 = vcmp.eq.s32.totalorder %v197_v47, 0 }
  0x82   : > { %v125_v21 = vpop.permute.xlu1 %124  ;;  %v121_v22 = vpop.permute.xlu0 %120 }
  0x83   : > { %v131_v35 = vsel %vm128_vm6, %v125_v21, %v121_v22 }
  0x84   : > { %v134_v44 = vadd.f32 %v131_v35, %v396_v0 }
  0x86   : > { %v136_v28 = vpop.permute.xlu1 %135  ;;  %v123_v29 = vpop.permute.xlu0 %122 }
  0x87   : > { %v129_v30 = vsel %vm128_vm6, %v123_v29, %v125_v21  ;;  %v130_v31 = vsel %vm128_vm6, %v121_v22, %v123_v29 }
  0x88   : > { %v132_v37 = vadd.f32 %v130_v31, %v398_v1  ;;  %v133_v38 = vadd.f32 %v129_v30, %v402_v2 }
  0x8a   : > { %v140_v39 = vpop.permute.xlu1 %139  ;;  %v138_v40 = vpop.permute.xlu0 %137 }
  0x8b   : > { %v144_v41 = vsel %vm141_vm9, %v140_v39, %v136_v28  ;;  %v142_v42 = vsel %vm141_vm9, %v138_v40, %v140_v39  ;;  %v143_v43 = vsel %vm141_vm9, %v136_v28, %v138_v40 }
  0x8c   : > { %v145_v45 = vadd.f32 %v143_v43, %v132_v37  ;;  %v146_v46 = vadd.f32 %v142_v42, %v133_v38  ;;  %v147_v48 = vadd.f32 %v144_v41, %v134_v44 }
  0x8e   : > { %v207_v49 = vsel %vm198_vm11, %v145_v45, 0.0  ;;  %v208_v50 = vsel %vm199_vm12, %v146_v46, 0.0  ;;  %v209_v51 = vsel %vm200_vm13, %v147_v48, 0.0 }
  0x8f   : > { %210 = vrot.lane.b32.xlu0 %v207_v49, %s368_s14  ;;  %212 = vrot.lane.b32.xlu1 %v208_v50, %s368_s14 }
  0x93   : > { %214 = vrot.lane.b32.xlu0 %v209_v51, %s368_s14  ;;  %223 = vrot.lane.b32.xlu1 %v207_v49, %s369_s15 }
  0x97   : > { %225 = vrot.lane.b32.xlu0 %v208_v50, %s369_s15  ;;  %227 = vrot.lane.b32.xlu1 %v209_v51, %s369_s15 }
 0x101   : > { %v211_v52 = vpop.permute.xlu0 %210  ;;  %v213_v53 = vpop.permute.xlu1 %212 }
 0x102   : > { %v218_v56 = vsel %vm216_vm14, %v211_v52, %v213_v53 }
 0x103   : > { %v221_v59 = vadd.f32 %v218_v56, %v208_v50 }
 0x105   : > { %v215_v54 = vpop.permute.xlu0 %214  ;;  %v224_v55 = vpop.permute.xlu1 %223 }
 0x106   : > { %v217_v57 = vsel %vm216_vm14, %v213_v53, %v215_v54  ;;  %v219_v58 = vsel %vm216_vm14, %v215_v54, %v211_v52 }
 0x107   : > { %v220_v60 = vadd.f32 %v219_v58, %v207_v49  ;;  %v222_v61 = vadd.f32 %v217_v57, %v209_v51 }
 0x109   : > { %v226_v62 = vpop.permute.xlu0 %225  ;;  %v228_v63 = vpop.permute.xlu1 %227 }
 0x10a   : > { %v231_v3 = vsel %vm229_vm15, %v224_v55, %v226_v62  ;;  %v230_v5 = vsel %vm229_vm15, %v226_v62, %v228_v63  ;;  %v232_v6 = vsel %vm229_vm15, %v228_v63, %v224_v55 }
 0x10b   : > { %v234_v7 = vadd.f32 %v231_v3, %v221_v59  ;;  %v233_v8 = vadd.f32 %v232_v6, %v220_v60  ;;  %v235_v9 = vadd.f32 %v230_v5, %v222_v61 }
 0x10d   : > { %v323_v10 = vmul.f32 -1.442695, %v234_v7  ;;  %v322_v11 = vmul.f32 -1.442695, %v233_v8  ;;  %v324_v12 = vmul.f32 -1.442695, %v235_v9 }
 0x10f   : > { %346 = vpow2.f32 %v323_v10 }
 0x110   : > { %348 = vpow2.f32 %v322_v11 }
 0x111   : > { %350 = vpow2.f32 %v324_v12 }
 0x11c   : > { %v347_v13 = vpop.eup %346 }
 0x11d   : > { %v349_v4 = vpop.eup %348  ;;  %v246_v14 = vadd.f32 1.0, %v347_v13 }
 0x11e   : > { %v351_v15 = vpop.eup %350  ;;  %v245_v16 = vadd.f32 1.0, %v349_v4 }
 0x11f   : > { %352 = vrcp.f32 %v246_v14  ;;  %v247_v17 = vadd.f32 1.0, %v351_v15 }
 0x120   : > { %354 = vrcp.f32 %v245_v16 }
 0x121   : > { %356 = vrcp.f32 %v247_v17 }
 0x12c   : > { %v353_v18 = vpop.eup %352 }
 0x12d   : > { %v355_v19 = vpop.eup %354  ;;  %v255_v20 = vmul.f32 %v353_v18, %v402_v2 }
 0x12e   : > { %v357_v21 = vpop.eup %356  ;;  %v254_v22 = vmul.f32 %v355_v19, %v398_v1 }
 0x12f   : > { %258 = vst [vmem:[%s116_s18 + $0x8] sm:$0xff] %v255_v20  ;;  %v256_v23 = vmul.f32 %v357_v21, %v396_v0 }
 0x130   : > { %257 = vst [vmem:[%s116_s18] sm:$0xff] %v254_v22 }
 0x131   : > { %259 = vst [vmem:[%s116_s18 + $0x10] sm:$0xff] %v256_v23 }
 0x132 PF: > { %s11_s6 = sadd.s32 1, %s364_s6  }
 0x133   : > { %p8_p4 = scmp.ge.s32.totalorder %s11_s6, 4  }
 0x135   :  { %10 = sbr.rel (!%p8_p4) target bundleno = 1 (0x1), region = 54 }

</bundles_post_ra>
